<compile_context>
chip_gen: v6e
topology: v6e:2x2x1
jax: 0.10.0
libtpu: 0.0.40
codegen_flags: <defaults>
</compile_context>

<pallas_src>
import jax
import jax.numpy as jnp
from jax import lax
from jax.experimental import pallas as pl
from jax.experimental.pallas import tpu as pltpu

D_IN = 4          # input_size
HID = 32          # hyperparams.n_conv_in  (LSTM hidden size)
NUM_LAYERS = 1    # hyperparams.kernel_size_1
SEQ = 8           # hyperparams.n_channel  (sequence length)
FC1 = 64          # hyperparams.n_conv_in2
FC2 = 32          # hyperparams.n_conv_in3
OUT = 10          # output_size
NEG_SLOPE = 0.01  # hyperparams.negative_slope
BN_EPS = 1e-5
BATCH = 2

LANES = 4 * HID   # 128: common lane width for every slab section

# 8-row-aligned slab layout (rows x 128 lanes, float32)
R_WIH = 0                      # (D_IN, 128)  input->gate weights (rows 4:8 zero)
R_WHH = 8                      # (HID, 128)   hidden->gate weights
R_BL = 40                      # (1, 128)     combined LSTM bias
R_W1 = 48                      # (SEQ*HID, 128) BN1-folded FC1 (cols 64:128 zero)
R_B1 = 304                     # (1, 128)     BN1-folded FC1 bias
R_W2 = 312                     # (128, 128)   BN2-folded FC2 (only [0:64, 0:32] real)
R_B2 = 440                     # (1, 128)     BN2-folded FC2 bias
R_W3 = 448                     # (128, 128)   FC3 (only [0:32, 0:10] real)
R_B3 = 576                     # (1, 128)     FC3 bias
SLAB_ROWS = 584


# ------------------------- fused LSTM + FC kernel ---------------------------
def fused_gru_kernel(x_ref, slab_ref, out_ref):
    """Fused LSTM recurrence + streamed FC1 + FC2 + FC3 (BN pre-folded).

    x_ref   : (B*T, D) batch-major flattened input (row = b*T + t)
    slab_ref: (SLAB_ROWS, 128) packed parameter slab (see layout above)
    out_ref : (B, 128) lane-dense output; real logits in lanes 0:OUT
    """
    B = out_ref.shape[0]
    H = HID
    G = 4 * H
    T = x_ref.shape[0] // B

    w_ih = slab_ref[R_WIH:R_WIH + D_IN, :]                      # (D, 4H)
    w_hh = slab_ref[R_WHH:R_WHH + H, :]                         # (H, 4H)
    b_l = slab_ref[R_BL:R_BL + 1, :]                            # (1, 4H)

    # Hoisted input projection: all timesteps in one MXU pass, off the serial
    # path.  Rows stay batch-major (b*T + t).
    xw = jnp.dot(x_ref[...], w_ih,
                 preferred_element_type=jnp.float32) + b_l      # (B*T, 4H)

    # Per-lane constants for ONE full-width activation per step:
    #   sigmoid lanes (i, f, o): 0.5 * tanh(x / 2) + 0.5   (exact identity)
    #   g lanes                : tanh(x)
    lane = lax.broadcasted_iota(jnp.int32, (B, G), 1)
    is_g = (lane >= 2 * H) & (lane < 3 * H)
    a_sc = jnp.where(is_g, 1.0, 0.5)                            # pre/post scale
    a_off = jnp.where(is_g, 0.0, 0.5)                           # post offset

    h = jnp.zeros((B, H), jnp.float32)
    c = jnp.zeros((B, H), jnp.float32)
    # Streamed FC1 accumulator, initialised with the folded bias (padded lanes
    # 64:128 are zero).
    acc1 = jnp.broadcast_to(slab_ref[R_B1:R_B1 + 1, :], (B, G))

    # Static unroll of the short fixed-length recurrence (T = 8): only
    # h @ w_hh -> activation -> (c, h) sits on the serial critical path; the
    # per-step FC1 matmul depends only on h_t and overlaps step t+1.
    for t in range(T):
        gx = jnp.concatenate(
            [xw[b * T + t:b * T + t + 1, :] for b in range(B)], axis=0)   # (B, 4H)
        gates = gx + jnp.dot(h, w_hh, preferred_element_type=jnp.float32)
        act = jnp.tanh(gates * a_sc) * a_sc + a_off             # one EUP pass
        i_g = act[:, 0 * H:1 * H]
        f_g = act[:, 1 * H:2 * H]
        g_g = act[:, 2 * H:3 * H]
        o_g = act[:, 3 * H:4 * H]
        c = f_g * c + i_g * g_g
        h = o_g * jnp.tanh(c)
        # Streamed (BN1-folded) FC1 partial: h_t @ w1[t*H:(t+1)*H, :].
        w1_t = slab_ref[R_W1 + t * H:R_W1 + (t + 1) * H, :]     # (H, 128)
        acc1 = acc1 + jnp.dot(h, w1_t, preferred_element_type=jnp.float32)

    # LeakyReLU(0.01) followed by ReLU == ReLU (slope > 0, ReLU second).
    a1 = jnp.maximum(acc1, 0.0)                                 # (B, 128)

    # Linear(FC1 -> FC2) + folded BN + LeakyReLU (lane-padded to 128).
    w2 = slab_ref[R_W2:R_W2 + LANES, :]
    b2 = slab_ref[R_B2:R_B2 + 1, :]
    a2 = jnp.dot(a1, w2, preferred_element_type=jnp.float32) + b2
    a2 = jnp.where(a2 > 0, a2, NEG_SLOPE * a2)

    # Final Linear(FC2 -> OUT), lane-padded; full-lane unmasked store.
    w3 = slab_ref[R_W3:R_W3 + LANES, :]
    b3 = slab_ref[R_B3:R_B3 + 1, :]
    out_ref[...] = jnp.dot(a2, w3, preferred_element_type=jnp.float32) + b3


# --------------------------- parameter preparation ---------------------------
def _fold_bn(w, b, gamma, beta, mean, var):
    """Fold an eval-mode BatchNorm1d into the preceding Linear."""
    s = gamma * lax.rsqrt(var + BN_EPS)            # (1, F)
    return w * s, s * (b - mean) + beta            # (in, F), (1, F)


def prepare_params(p):
    """One-time (outside jit) prep: fold BNs, zero-pad to 128 lanes, pack all
    parameters into a single 8-row-aligned (SLAB_ROWS, 128) VMEM slab."""
    w1f, b1f = _fold_bn(p["w1"], p["b1"], p["g1"], p["be1"], p["m1"], p["v1"])
    w2f, b2f = _fold_bn(p["w2"], p["b2"], p["g2"], p["be2"], p["m2"], p["v2"])

    def pad_cols(a):
        return jnp.pad(a, ((0, 0), (0, LANES - a.shape[1])))

    def pad_rows(a, rows):
        return jnp.pad(a, ((0, rows - a.shape[0]), (0, 0)))

    slab = jnp.concatenate([
        pad_rows(p["w_ih"], 8),                 # rows   0:8
        p["w_hh"],                              # rows   8:40
        pad_rows(p["b_lstm"], 8),               # rows  40:48
        pad_cols(w1f),                          # rows  48:304
        pad_rows(pad_cols(b1f), 8),             # rows 304:312
        pad_rows(pad_cols(w2f), LANES),         # rows 312:440
        pad_rows(pad_cols(b2f), 8),             # rows 440:448
        pad_rows(pad_cols(p["w3"]), LANES),     # rows 448:576
        pad_rows(pad_cols(p["b3"]), 8),         # rows 576:584
    ], axis=0).astype(jnp.float32)
    assert slab.shape == (SLAB_ROWS, LANES), slab.shape
    return slab


# ------------------------------ full module ---------------------------------
def gru_module_forward(x, slab):
    """x: (B, T, D) batch-first (like the PyTorch module); slab: packed params."""
    B, T, D = x.shape
    x2d = x.reshape(B * T, D)                      # batch-major, contiguous: free

    vmem_spec = pl.BlockSpec(memory_space=pltpu.MemorySpace.VMEM)
    out = pl.pallas_call(
        fused_gru_kernel,
        out_shape=jax.ShapeDtypeStruct((B, LANES), jnp.float32),
        in_specs=[vmem_spec, vmem_spec],
        out_specs=vmem_spec,
    )(x2d, slab)

    # Slice the real logits and unsqueeze(2).unsqueeze(3).
    return out[:, :OUT, None, None]


# --------------------------- pure-JAX reference ------------------------------
def ref_forward(x, p):
    """Reference uses the UNfolded params (separate eval-mode BatchNorm)."""
    B = x.shape[0]

    def cell(carry, x_t):
        h, c = carry
        gates = x_t @ p["w_ih"] + h @ p["w_hh"] + p["b_lstm"][0]
        i = jax.nn.sigmoid(gates[:, :HID])
        f = jax.nn.sigmoid(gates[:, HID:2 * HID])
        g = jnp.tanh(gates[:, 2 * HID:3 * HID])
        o = jax.nn.sigmoid(gates[:, 3 * HID:])
        c = f * c + i * g
        h = o * jnp.tanh(c)
        return (h, c), h

    h0 = jnp.zeros((B, HID), jnp.float32)
    c0 = jnp.zeros((B, HID), jnp.float32)
    _, hs = lax.scan(cell, (h0, c0), jnp.transpose(x, (1, 0, 2)))
    flat = jnp.transpose(hs, (1, 0, 2)).reshape(B, -1)

    def bn(h, g, b, m, v):
        return g * (h - m) * lax.rsqrt(v + BN_EPS) + b

    h = flat @ p["w1"] + p["b1"][0]
    h = bn(h, p["g1"][0], p["be1"][0], p["m1"][0], p["v1"][0])
    h = jnp.where(h > 0, h, NEG_SLOPE * h)
    h = jnp.maximum(h, 0.0)
    h = h @ p["w2"] + p["b2"][0]
    h = bn(h, p["g2"][0], p["be2"][0], p["m2"][0], p["v2"][0])
    h = jnp.where(h > 0, h, NEG_SLOPE * h)
    h = h @ p["w3"] + p["b3"][0]
    return h[:, :, None, None]


# --------------------------------- params ------------------------------------
def init_params(key):
    ks = jax.random.split(key, 20)
    s = 0.1
    p = {
        # LSTM (single layer, unidirectional); PyTorch weight_ih (4H,D) /
        # weight_hh (4H,H) stored pre-transposed; b_lstm = b_ih + b_hh combined.
        "w_ih": s * jax.random.normal(ks[0], (D_IN, 4 * HID), jnp.float32),
        "w_hh": s * jax.random.normal(ks[1], (HID, 4 * HID), jnp.float32),
        "b_lstm": s * jax.random.normal(ks[2], (1, 4 * HID), jnp.float32),
        # Linear(SEQ*HID -> FC1) + BatchNorm1d(FC1)
        "w1": s * jax.random.normal(ks[3], (SEQ * HID, FC1), jnp.float32),
        "b1": s * jax.random.normal(ks[4], (1, FC1), jnp.float32),
        "g1": 1.0 + s * jax.random.normal(ks[5], (1, FC1), jnp.float32),
        "be1": s * jax.random.normal(ks[6], (1, FC1), jnp.float32),
        "m1": s * jax.random.normal(ks[7], (1, FC1), jnp.float32),
        "v1": 0.5 + jnp.abs(jax.random.normal(ks[8], (1, FC1), jnp.float32)),
        # Linear(FC1 -> FC2) + BatchNorm1d(FC2)
        "w2": s * jax.random.normal(ks[9], (FC1, FC2), jnp.float32),
        "b2": s * jax.random.normal(ks[10], (1, FC2), jnp.float32),
        "g2": 1.0 + s * jax.random.normal(ks[11], (1, FC2), jnp.float32),
        "be2": s * jax.random.normal(ks[12], (1, FC2), jnp.float32),
        "m2": s * jax.random.normal(ks[13], (1, FC2), jnp.float32),
        "v2": 0.5 + jnp.abs(jax.random.normal(ks[14], (1, FC2), jnp.float32)),
        # Linear(FC2 -> OUT)
        "w3": s * jax.random.normal(ks[15], (FC2, OUT), jnp.float32),
        "b3": s * jax.random.normal(ks[16], (1, OUT), jnp.float32),
    }
    return p


if __name__ == "__main__":
    key = jax.random.PRNGKey(0)
    pkey, xkey = jax.random.split(key)
    params = init_params(pkey)
    slab = prepare_params(params)            # one-time BN folding + packing
    x = jax.random.normal(xkey, (BATCH, SEQ, D_IN), jnp.float32)

    out = jax.jit(gru_module_forward)(x, slab)
    out = jax.block_until_ready(out)
    assert out.shape == (BATCH, OUT, 1, 1), out.shape
    assert out.dtype == jnp.float32

    ref = jax.block_until_ready(ref_forward(x, params))
    assert jnp.allclose(out, ref, rtol=1e-4, atol=1e-4), (
        float(jnp.max(jnp.abs(out - ref))))

    print("KERNEL_OK")
</pallas_src>

<mosaic_0001>
module attributes {stable_mosaic.version = 11 : i64} {
  func.func @fused_gru_kernel(%arg0: memref<16x4xf32, #tpu.memory_space<vmem>>, %arg1: memref<584x128xf32, #tpu.memory_space<vmem>>, %arg2: memref<2x128xf32, #tpu.memory_space<vmem>>) attributes {dimension_semantics = [], scalar_prefetch = 0 : i64, scratch_operands = 0 : i64, tpu.core_type = #tpu.core_type<tc>} {
    %c0 = arith.constant 0 : index
    %c0_0 = arith.constant 0 : index
    %0 = vector.load %arg1[%c0, %c0_0] : memref<584x128xf32, #tpu.memory_space<vmem>>, vector<4x128xf32>
    %c8 = arith.constant 8 : index
    %c0_1 = arith.constant 0 : index
    %1 = vector.load %arg1[%c8, %c0_1] : memref<584x128xf32, #tpu.memory_space<vmem>>, vector<32x128xf32>
    %c40 = arith.constant 40 : index
    %c0_2 = arith.constant 0 : index
    %2 = vector.load %arg1[%c40, %c0_2] : memref<584x128xf32, #tpu.memory_space<vmem>>, vector<1x128xf32>
    %c0_3 = arith.constant 0 : index
    %c0_4 = arith.constant 0 : index
    %3 = vector.load %arg0[%c0_3, %c0_4] : memref<16x4xf32, #tpu.memory_space<vmem>>, vector<16x4xf32>
    %cst = arith.constant dense<0.000000e+00> : vector<16x128xf32>
    %4 = tpu.matmul %3, %0, %cst {dimension_numbers = #tpu.dot_dimension_numbers<[1], [0], [0], [1], [0, 0, 1, 1], [], []>} : vector<16x4xf32>, vector<4x128xf32>, vector<16x128xf32> -> vector<16x128xf32>
    %5 = vector.broadcast %2 : vector<1x128xf32> to vector<16x128xf32>
    %6 = arith.addf %4, %5 : vector<16x128xf32>
    %7 = tpu.iota {dimensions = array<i32: 1>} : vector<2x128xi32>
    %c64_i32 = arith.constant 64 : i32
    %8 = vector.broadcast %c64_i32 : i32 to vector<2x128xi32>
    %9 = arith.cmpi sge, %7, %8 : vector<2x128xi32>
    %c96_i32 = arith.constant 96 : i32
    %10 = vector.broadcast %c96_i32 : i32 to vector<2x128xi32>
    %11 = arith.cmpi slt, %7, %10 : vector<2x128xi32>
    %12 = arith.andi %9, %11 : vector<2x128xi1>
    %cst_5 = arith.constant 1.000000e+00 : f32
    %cst_6 = arith.constant 5.000000e-01 : f32
    %13 = vector.broadcast %cst_5 : f32 to vector<2x128xf32>
    %14 = vector.broadcast %cst_6 : f32 to vector<2x128xf32>
    %15 = arith.select %12, %13, %14 : vector<2x128xi1>, vector<2x128xf32>
    %cst_7 = arith.constant 0.000000e+00 : f32
    %cst_8 = arith.constant 5.000000e-01 : f32
    %16 = vector.broadcast %cst_7 : f32 to vector<2x128xf32>
    %17 = vector.broadcast %cst_8 : f32 to vector<2x128xf32>
    %18 = arith.select %12, %16, %17 : vector<2x128xi1>, vector<2x128xf32>
    %cst_9 = arith.constant 0.000000e+00 : f32
    %19 = vector.broadcast %cst_9 : f32 to vector<2x32xf32>
    %cst_10 = arith.constant 0.000000e+00 : f32
    %20 = vector.broadcast %cst_10 : f32 to vector<2x32xf32>
    %c304 = arith.constant 304 : index
    %c0_11 = arith.constant 0 : index
    %21 = vector.load %arg1[%c304, %c0_11] : memref<584x128xf32, #tpu.memory_space<vmem>>, vector<1x128xf32>
    %22 = vector.shape_cast %21 : vector<1x128xf32> to vector<1x128xf32>
    %23 = vector.broadcast %22 : vector<1x128xf32> to vector<2x128xf32>
    %24 = vector.extract_strided_slice %6 {offsets = [0, 0], sizes = [1, 128], strides = [1, 1]} : vector<16x128xf32> to vector<1x128xf32>
    %25 = vector.extract_strided_slice %6 {offsets = [8, 0], sizes = [1, 128], strides = [1, 1]} : vector<16x128xf32> to vector<1x128xf32>
    %26 = tpu.concatenate %24, %25 in 0 : vector<1x128xf32>, vector<1x128xf32> -> vector<2x128xf32>
    %cst_12 = arith.constant dense<0.000000e+00> : vector<2x128xf32>
    %27 = tpu.matmul %19, %1, %cst_12 {dimension_numbers = #tpu.dot_dimension_numbers<[1], [0], [0], [1], [0, 0, 1, 1], [], []>} : vector<2x32xf32>, vector<32x128xf32>, vector<2x128xf32> -> vector<2x128xf32>
    %28 = arith.addf %26, %27 : vector<2x128xf32>
    %29 = arith.mulf %28, %15 : vector<2x128xf32>
    %30 = math.tanh %29 : vector<2x128xf32>
    %31 = arith.mulf %30, %15 : vector<2x128xf32>
    %32 = arith.addf %31, %18 : vector<2x128xf32>
    %33 = vector.extract_strided_slice %32 {offsets = [0, 0], sizes = [2, 32], strides = [1, 1]} : vector<2x128xf32> to vector<2x32xf32>
    %34 = vector.extract_strided_slice %32 {offsets = [0, 32], sizes = [2, 32], strides = [1, 1]} : vector<2x128xf32> to vector<2x32xf32>
    %35 = vector.extract_strided_slice %32 {offsets = [0, 64], sizes = [2, 32], strides = [1, 1]} : vector<2x128xf32> to vector<2x32xf32>
    %36 = vector.extract_strided_slice %32 {offsets = [0, 96], sizes = [2, 32], strides = [1, 1]} : vector<2x128xf32> to vector<2x32xf32>
    %37 = arith.mulf %34, %20 : vector<2x32xf32>
    %38 = arith.mulf %33, %35 : vector<2x32xf32>
    %39 = arith.addf %37, %38 : vector<2x32xf32>
    %40 = math.tanh %39 : vector<2x32xf32>
    %41 = arith.mulf %36, %40 : vector<2x32xf32>
    %c48 = arith.constant 48 : index
    %c0_13 = arith.constant 0 : index
    %42 = vector.load %arg1[%c48, %c0_13] : memref<584x128xf32, #tpu.memory_space<vmem>>, vector<32x128xf32>
    %cst_14 = arith.constant dense<0.000000e+00> : vector<2x128xf32>
    %43 = tpu.matmul %41, %42, %cst_14 {dimension_numbers = #tpu.dot_dimension_numbers<[1], [0], [0], [1], [0, 0, 1, 1], [], []>} : vector<2x32xf32>, vector<32x128xf32>, vector<2x128xf32> -> vector<2x128xf32>
    %44 = arith.addf %23, %43 : vector<2x128xf32>
    %45 = vector.extract_strided_slice %6 {offsets = [1, 0], sizes = [1, 128], strides = [1, 1]} : vector<16x128xf32> to vector<1x128xf32>
    %46 = vector.extract_strided_slice %6 {offsets = [9, 0], sizes = [1, 128], strides = [1, 1]} : vector<16x128xf32> to vector<1x128xf32>
    %47 = tpu.concatenate %45, %46 in 0 : vector<1x128xf32>, vector<1x128xf32> -> vector<2x128xf32>
    %cst_15 = arith.constant dense<0.000000e+00> : vector<2x128xf32>
    %48 = tpu.matmul %41, %1, %cst_15 {dimension_numbers = #tpu.dot_dimension_numbers<[1], [0], [0], [1], [0, 0, 1, 1], [], []>} : vector<2x32xf32>, vector<32x128xf32>, vector<2x128xf32> -> vector<2x128xf32>
    %49 = arith.addf %47, %48 : vector<2x128xf32>
    %50 = arith.mulf %49, %15 : vector<2x128xf32>
    %51 = math.tanh %50 : vector<2x128xf32>
    %52 = arith.mulf %51, %15 : vector<2x128xf32>
    %53 = arith.addf %52, %18 : vector<2x128xf32>
    %54 = vector.extract_strided_slice %53 {offsets = [0, 0], sizes = [2, 32], strides = [1, 1]} : vector<2x128xf32> to vector<2x32xf32>
    %55 = vector.extract_strided_slice %53 {offsets = [0, 32], sizes = [2, 32], strides = [1, 1]} : vector<2x128xf32> to vector<2x32xf32>
    %56 = vector.extract_strided_slice %53 {offsets = [0, 64], sizes = [2, 32], strides = [1, 1]} : vector<2x128xf32> to vector<2x32xf32>
    %57 = vector.extract_strided_slice %53 {offsets = [0, 96], sizes = [2, 32], strides = [1, 1]} : vector<2x128xf32> to vector<2x32xf32>
    %58 = arith.mulf %55, %39 : vector<2x32xf32>
    %59 = arith.mulf %54, %56 : vector<2x32xf32>
    %60 = arith.addf %58, %59 : vector<2x32xf32>
    %61 = math.tanh %60 : vector<2x32xf32>
    %62 = arith.mulf %57, %61 : vector<2x32xf32>
    %c80 = arith.constant 80 : index
    %c0_16 = arith.constant 0 : index
    %63 = vector.load %arg1[%c80, %c0_16] : memref<584x128xf32, #tpu.memory_space<vmem>>, vector<32x128xf32>
    %cst_17 = arith.constant dense<0.000000e+00> : vector<2x128xf32>
    %64 = tpu.matmul %62, %63, %cst_17 {dimension_numbers = #tpu.dot_dimension_numbers<[1], [0], [0], [1], [0, 0, 1, 1], [], []>} : vector<2x32xf32>, vector<32x128xf32>, vector<2x128xf32> -> vector<2x128xf32>
    %65 = arith.addf %44, %64 : vector<2x128xf32>
    %66 = vector.extract_strided_slice %6 {offsets = [2, 0], sizes = [1, 128], strides = [1, 1]} : vector<16x128xf32> to vector<1x128xf32>
    %67 = vector.extract_strided_slice %6 {offsets = [10, 0], sizes = [1, 128], strides = [1, 1]} : vector<16x128xf32> to vector<1x128xf32>
    %68 = tpu.concatenate %66, %67 in 0 : vector<1x128xf32>, vector<1x128xf32> -> vector<2x128xf32>
    %cst_18 = arith.constant dense<0.000000e+00> : vector<2x128xf32>
    %69 = tpu.matmul %62, %1, %cst_18 {dimension_numbers = #tpu.dot_dimension_numbers<[1], [0], [0], [1], [0, 0, 1, 1], [], []>} : vector<2x32xf32>, vector<32x128xf32>, vector<2x128xf32> -> vector<2x128xf32>
    %70 = arith.addf %68, %69 : vector<2x128xf32>
    %71 = arith.mulf %70, %15 : vector<2x128xf32>
    %72 = math.tanh %71 : vector<2x128xf32>
    %73 = arith.mulf %72, %15 : vector<2x128xf32>
    %74 = arith.addf %73, %18 : vector<2x128xf32>
    %75 = vector.extract_strided_slice %74 {offsets = [0, 0], sizes = [2, 32], strides = [1, 1]} : vector<2x128xf32> to vector<2x32xf32>
    %76 = vector.extract_strided_slice %74 {offsets = [0, 32], sizes = [2, 32], strides = [1, 1]} : vector<2x128xf32> to vector<2x32xf32>
    %77 = vector.extract_strided_slice %74 {offsets = [0, 64], sizes = [2, 32], strides = [1, 1]} : vector<2x128xf32> to vector<2x32xf32>
    %78 = vector.extract_strided_slice %74 {offsets = [0, 96], sizes = [2, 32], strides = [1, 1]} : vector<2x128xf32> to vector<2x32xf32>
    %79 = arith.mulf %76, %60 : vector<2x32xf32>
    %80 = arith.mulf %75, %77 : vector<2x32xf32>
    %81 = arith.addf %79, %80 : vector<2x32xf32>
    %82 = math.tanh %81 : vector<2x32xf32>
    %83 = arith.mulf %78, %82 : vector<2x32xf32>
    %c112 = arith.constant 112 : index
    %c0_19 = arith.constant 0 : index
    %84 = vector.load %arg1[%c112, %c0_19] : memref<584x128xf32, #tpu.memory_space<vmem>>, vector<32x128xf32>
    %cst_20 = arith.constant dense<0.000000e+00> : vector<2x128xf32>
    %85 = tpu.matmul %83, %84, %cst_20 {dimension_numbers = #tpu.dot_dimension_numbers<[1], [0], [0], [1], [0, 0, 1, 1], [], []>} : vector<2x32xf32>, vector<32x128xf32>, vector<2x128xf32> -> vector<2x128xf32>
    %86 = arith.addf %65, %85 : vector<2x128xf32>
    %87 = vector.extract_strided_slice %6 {offsets = [3, 0], sizes = [1, 128], strides = [1, 1]} : vector<16x128xf32> to vector<1x128xf32>
    %88 = vector.extract_strided_slice %6 {offsets = [11, 0], sizes = [1, 128], strides = [1, 1]} : vector<16x128xf32> to vector<1x128xf32>
    %89 = tpu.concatenate %87, %88 in 0 : vector<1x128xf32>, vector<1x128xf32> -> vector<2x128xf32>
    %cst_21 = arith.constant dense<0.000000e+00> : vector<2x128xf32>
    %90 = tpu.matmul %83, %1, %cst_21 {dimension_numbers = #tpu.dot_dimension_numbers<[1], [0], [0], [1], [0, 0, 1, 1], [], []>} : vector<2x32xf32>, vector<32x128xf32>, vector<2x128xf32> -> vector<2x128xf32>
    %91 = arith.addf %89, %90 : vector<2x128xf32>
    %92 = arith.mulf %91, %15 : vector<2x128xf32>
    %93 = math.tanh %92 : vector<2x128xf32>
    %94 = arith.mulf %93, %15 : vector<2x128xf32>
    %95 = arith.addf %94, %18 : vector<2x128xf32>
    %96 = vector.extract_strided_slice %95 {offsets = [0, 0], sizes = [2, 32], strides = [1, 1]} : vector<2x128xf32> to vector<2x32xf32>
    %97 = vector.extract_strided_slice %95 {offsets = [0, 32], sizes = [2, 32], strides = [1, 1]} : vector<2x128xf32> to vector<2x32xf32>
    %98 = vector.extract_strided_slice %95 {offsets = [0, 64], sizes = [2, 32], strides = [1, 1]} : vector<2x128xf32> to vector<2x32xf32>
    %99 = vector.extract_strided_slice %95 {offsets = [0, 96], sizes = [2, 32], strides = [1, 1]} : vector<2x128xf32> to vector<2x32xf32>
    %100 = arith.mulf %97, %81 : vector<2x32xf32>
    %101 = arith.mulf %96, %98 : vector<2x32xf32>
    %102 = arith.addf %100, %101 : vector<2x32xf32>
    %103 = math.tanh %102 : vector<2x32xf32>
    %104 = arith.mulf %99, %103 : vector<2x32xf32>
    %c144 = arith.constant 144 : index
    %c0_22 = arith.constant 0 : index
    %105 = vector.load %arg1[%c144, %c0_22] : memref<584x128xf32, #tpu.memory_space<vmem>>, vector<32x128xf32>
    %cst_23 = arith.constant dense<0.000000e+00> : vector<2x128xf32>
    %106 = tpu.matmul %104, %105, %cst_23 {dimension_numbers = #tpu.dot_dimension_numbers<[1], [0], [0], [1], [0, 0, 1, 1], [], []>} : vector<2x32xf32>, vector<32x128xf32>, vector<2x128xf32> -> vector<2x128xf32>
    %107 = arith.addf %86, %106 : vector<2x128xf32>
    %108 = vector.extract_strided_slice %6 {offsets = [4, 0], sizes = [1, 128], strides = [1, 1]} : vector<16x128xf32> to vector<1x128xf32>
    %109 = vector.extract_strided_slice %6 {offsets = [12, 0], sizes = [1, 128], strides = [1, 1]} : vector<16x128xf32> to vector<1x128xf32>
    %110 = tpu.concatenate %108, %109 in 0 : vector<1x128xf32>, vector<1x128xf32> -> vector<2x128xf32>
    %cst_24 = arith.constant dense<0.000000e+00> : vector<2x128xf32>
    %111 = tpu.matmul %104, %1, %cst_24 {dimension_numbers = #tpu.dot_dimension_numbers<[1], [0], [0], [1], [0, 0, 1, 1], [], []>} : vector<2x32xf32>, vector<32x128xf32>, vector<2x128xf32> -> vector<2x128xf32>
    %112 = arith.addf %110, %111 : vector<2x128xf32>
    %113 = arith.mulf %112, %15 : vector<2x128xf32>
    %114 = math.tanh %113 : vector<2x128xf32>
    %115 = arith.mulf %114, %15 : vector<2x128xf32>
    %116 = arith.addf %115, %18 : vector<2x128xf32>
    %117 = vector.extract_strided_slice %116 {offsets = [0, 0], sizes = [2, 32], strides = [1, 1]} : vector<2x128xf32> to vector<2x32xf32>
    %118 = vector.extract_strided_slice %116 {offsets = [0, 32], sizes = [2, 32], strides = [1, 1]} : vector<2x128xf32> to vector<2x32xf32>
    %119 = vector.extract_strided_slice %116 {offsets = [0, 64], sizes = [2, 32], strides = [1, 1]} : vector<2x128xf32> to vector<2x32xf32>
    %120 = vector.extract_strided_slice %116 {offsets = [0, 96], sizes = [2, 32], strides = [1, 1]} : vector<2x128xf32> to vector<2x32xf32>
    %121 = arith.mulf %118, %102 : vector<2x32xf32>
    %122 = arith.mulf %117, %119 : vector<2x32xf32>
    %123 = arith.addf %121, %122 : vector<2x32xf32>
    %124 = math.tanh %123 : vector<2x32xf32>
    %125 = arith.mulf %120, %124 : vector<2x32xf32>
    %c176 = arith.constant 176 : index
    %c0_25 = arith.constant 0 : index
    %126 = vector.load %arg1[%c176, %c0_25] : memref<584x128xf32, #tpu.memory_space<vmem>>, vector<32x128xf32>
    %cst_26 = arith.constant dense<0.000000e+00> : vector<2x128xf32>
    %127 = tpu.matmul %125, %126, %cst_26 {dimension_numbers = #tpu.dot_dimension_numbers<[1], [0], [0], [1], [0, 0, 1, 1], [], []>} : vector<2x32xf32>, vector<32x128xf32>, vector<2x128xf32> -> vector<2x128xf32>
    %128 = arith.addf %107, %127 : vector<2x128xf32>
    %129 = vector.extract_strided_slice %6 {offsets = [5, 0], sizes = [1, 128], strides = [1, 1]} : vector<16x128xf32> to vector<1x128xf32>
    %130 = vector.extract_strided_slice %6 {offsets = [13, 0], sizes = [1, 128], strides = [1, 1]} : vector<16x128xf32> to vector<1x128xf32>
    %131 = tpu.concatenate %129, %130 in 0 : vector<1x128xf32>, vector<1x128xf32> -> vector<2x128xf32>
    %cst_27 = arith.constant dense<0.000000e+00> : vector<2x128xf32>
    %132 = tpu.matmul %125, %1, %cst_27 {dimension_numbers = #tpu.dot_dimension_numbers<[1], [0], [0], [1], [0, 0, 1, 1], [], []>} : vector<2x32xf32>, vector<32x128xf32>, vector<2x128xf32> -> vector<2x128xf32>
    %133 = arith.addf %131, %132 : vector<2x128xf32>
    %134 = arith.mulf %133, %15 : vector<2x128xf32>
    %135 = math.tanh %134 : vector<2x128xf32>
    %136 = arith.mulf %135, %15 : vector<2x128xf32>
    %137 = arith.addf %136, %18 : vector<2x128xf32>
    %138 = vector.extract_strided_slice %137 {offsets = [0, 0], sizes = [2, 32], strides = [1, 1]} : vector<2x128xf32> to vector<2x32xf32>
    %139 = vector.extract_strided_slice %137 {offsets = [0, 32], sizes = [2, 32], strides = [1, 1]} : vector<2x128xf32> to vector<2x32xf32>
    %140 = vector.extract_strided_slice %137 {offsets = [0, 64], sizes = [2, 32], strides = [1, 1]} : vector<2x128xf32> to vector<2x32xf32>
    %141 = vector.extract_strided_slice %137 {offsets = [0, 96], sizes = [2, 32], strides = [1, 1]} : vector<2x128xf32> to vector<2x32xf32>
    %142 = arith.mulf %139, %123 : vector<2x32xf32>
    %143 = arith.mulf %138, %140 : vector<2x32xf32>
    %144 = arith.addf %142, %143 : vector<2x32xf32>
    %145 = math.tanh %144 : vector<2x32xf32>
    %146 = arith.mulf %141, %145 : vector<2x32xf32>
    %c208 = arith.constant 208 : index
    %c0_28 = arith.constant 0 : index
    %147 = vector.load %arg1[%c208, %c0_28] : memref<584x128xf32, #tpu.memory_space<vmem>>, vector<32x128xf32>
    %cst_29 = arith.constant dense<0.000000e+00> : vector<2x128xf32>
    %148 = tpu.matmul %146, %147, %cst_29 {dimension_numbers = #tpu.dot_dimension_numbers<[1], [0], [0], [1], [0, 0, 1, 1], [], []>} : vector<2x32xf32>, vector<32x128xf32>, vector<2x128xf32> -> vector<2x128xf32>
    %149 = arith.addf %128, %148 : vector<2x128xf32>
    %150 = vector.extract_strided_slice %6 {offsets = [6, 0], sizes = [1, 128], strides = [1, 1]} : vector<16x128xf32> to vector<1x128xf32>
    %151 = vector.extract_strided_slice %6 {offsets = [14, 0], sizes = [1, 128], strides = [1, 1]} : vector<16x128xf32> to vector<1x128xf32>
    %152 = tpu.concatenate %150, %151 in 0 : vector<1x128xf32>, vector<1x128xf32> -> vector<2x128xf32>
    %cst_30 = arith.constant dense<0.000000e+00> : vector<2x128xf32>
    %153 = tpu.matmul %146, %1, %cst_30 {dimension_numbers = #tpu.dot_dimension_numbers<[1], [0], [0], [1], [0, 0, 1, 1], [], []>} : vector<2x32xf32>, vector<32x128xf32>, vector<2x128xf32> -> vector<2x128xf32>
    %154 = arith.addf %152, %153 : vector<2x128xf32>
    %155 = arith.mulf %154, %15 : vector<2x128xf32>
    %156 = math.tanh %155 : vector<2x128xf32>
    %157 = arith.mulf %156, %15 : vector<2x128xf32>
    %158 = arith.addf %157, %18 : vector<2x128xf32>
    %159 = vector.extract_strided_slice %158 {offsets = [0, 0], sizes = [2, 32], strides = [1, 1]} : vector<2x128xf32> to vector<2x32xf32>
    %160 = vector.extract_strided_slice %158 {offsets = [0, 32], sizes = [2, 32], strides = [1, 1]} : vector<2x128xf32> to vector<2x32xf32>
    %161 = vector.extract_strided_slice %158 {offsets = [0, 64], sizes = [2, 32], strides = [1, 1]} : vector<2x128xf32> to vector<2x32xf32>
    %162 = vector.extract_strided_slice %158 {offsets = [0, 96], sizes = [2, 32], strides = [1, 1]} : vector<2x128xf32> to vector<2x32xf32>
    %163 = arith.mulf %160, %144 : vector<2x32xf32>
    %164 = arith.mulf %159, %161 : vector<2x32xf32>
    %165 = arith.addf %163, %164 : vector<2x32xf32>
    %166 = math.tanh %165 : vector<2x32xf32>
    %167 = arith.mulf %162, %166 : vector<2x32xf32>
    %c240 = arith.constant 240 : index
    %c0_31 = arith.constant 0 : index
    %168 = vector.load %arg1[%c240, %c0_31] : memref<584x128xf32, #tpu.memory_space<vmem>>, vector<32x128xf32>
    %cst_32 = arith.constant dense<0.000000e+00> : vector<2x128xf32>
    %169 = tpu.matmul %167, %168, %cst_32 {dimension_numbers = #tpu.dot_dimension_numbers<[1], [0], [0], [1], [0, 0, 1, 1], [], []>} : vector<2x32xf32>, vector<32x128xf32>, vector<2x128xf32> -> vector<2x128xf32>
    %170 = arith.addf %149, %169 : vector<2x128xf32>
    %171 = vector.extract_strided_slice %6 {offsets = [7, 0], sizes = [1, 128], strides = [1, 1]} : vector<16x128xf32> to vector<1x128xf32>
    %172 = vector.extract_strided_slice %6 {offsets = [15, 0], sizes = [1, 128], strides = [1, 1]} : vector<16x128xf32> to vector<1x128xf32>
    %173 = tpu.concatenate %171, %172 in 0 : vector<1x128xf32>, vector<1x128xf32> -> vector<2x128xf32>
    %cst_33 = arith.constant dense<0.000000e+00> : vector<2x128xf32>
    %174 = tpu.matmul %167, %1, %cst_33 {dimension_numbers = #tpu.dot_dimension_numbers<[1], [0], [0], [1], [0, 0, 1, 1], [], []>} : vector<2x32xf32>, vector<32x128xf32>, vector<2x128xf32> -> vector<2x128xf32>
    %175 = arith.addf %173, %174 : vector<2x128xf32>
    %176 = arith.mulf %175, %15 : vector<2x128xf32>
    %177 = math.tanh %176 : vector<2x128xf32>
    %178 = arith.mulf %177, %15 : vector<2x128xf32>
    %179 = arith.addf %178, %18 : vector<2x128xf32>
    %180 = vector.extract_strided_slice %179 {offsets = [0, 0], sizes = [2, 32], strides = [1, 1]} : vector<2x128xf32> to vector<2x32xf32>
    %181 = vector.extract_strided_slice %179 {offsets = [0, 32], sizes = [2, 32], strides = [1, 1]} : vector<2x128xf32> to vector<2x32xf32>
    %182 = vector.extract_strided_slice %179 {offsets = [0, 64], sizes = [2, 32], strides = [1, 1]} : vector<2x128xf32> to vector<2x32xf32>
    %183 = vector.extract_strided_slice %179 {offsets = [0, 96], sizes = [2, 32], strides = [1, 1]} : vector<2x128xf32> to vector<2x32xf32>
    %184 = arith.mulf %181, %165 : vector<2x32xf32>
    %185 = arith.mulf %180, %182 : vector<2x32xf32>
    %186 = arith.addf %184, %185 : vector<2x32xf32>
    %187 = math.tanh %186 : vector<2x32xf32>
    %188 = arith.mulf %183, %187 : vector<2x32xf32>
    %c272 = arith.constant 272 : index
    %c0_34 = arith.constant 0 : index
    %189 = vector.load %arg1[%c272, %c0_34] : memref<584x128xf32, #tpu.memory_space<vmem>>, vector<32x128xf32>
    %cst_35 = arith.constant dense<0.000000e+00> : vector<2x128xf32>
    %190 = tpu.matmul %188, %189, %cst_35 {dimension_numbers = #tpu.dot_dimension_numbers<[1], [0], [0], [1], [0, 0, 1, 1], [], []>} : vector<2x32xf32>, vector<32x128xf32>, vector<2x128xf32> -> vector<2x128xf32>
    %191 = arith.addf %170, %190 : vector<2x128xf32>
    %cst_36 = arith.constant 0.000000e+00 : f32
    %192 = vector.broadcast %cst_36 : f32 to vector<2x128xf32>
    %193 = arith.maximumf %191, %192 : vector<2x128xf32>
    %c312 = arith.constant 312 : index
    %c0_37 = arith.constant 0 : index
    %194 = vector.load %arg1[%c312, %c0_37] : memref<584x128xf32, #tpu.memory_space<vmem>>, vector<128x128xf32>
    %c440 = arith.constant 440 : index
    %c0_38 = arith.constant 0 : index
    %195 = vector.load %arg1[%c440, %c0_38] : memref<584x128xf32, #tpu.memory_space<vmem>>, vector<1x128xf32>
    %cst_39 = arith.constant dense<0.000000e+00> : vector<2x128xf32>
    %196 = tpu.matmul %193, %194, %cst_39 {dimension_numbers = #tpu.dot_dimension_numbers<[1], [0], [0], [1], [0, 0, 1, 1], [], []>} : vector<2x128xf32>, vector<128x128xf32>, vector<2x128xf32> -> vector<2x128xf32>
    %197 = vector.broadcast %195 : vector<1x128xf32> to vector<2x128xf32>
    %198 = arith.addf %196, %197 : vector<2x128xf32>
    %cst_40 = arith.constant 0.000000e+00 : f32
    %199 = vector.broadcast %cst_40 : f32 to vector<2x128xf32>
    %200 = arith.cmpf ogt, %198, %199 : vector<2x128xf32>
    %cst_41 = arith.constant 0.00999999977 : f32
    %201 = vector.broadcast %cst_41 : f32 to vector<2x128xf32>
    %202 = arith.mulf %201, %198 : vector<2x128xf32>
    %203 = arith.select %200, %198, %202 : vector<2x128xi1>, vector<2x128xf32>
    %c448 = arith.constant 448 : index
    %c0_42 = arith.constant 0 : index
    %204 = vector.load %arg1[%c448, %c0_42] : memref<584x128xf32, #tpu.memory_space<vmem>>, vector<128x128xf32>
    %c576 = arith.constant 576 : index
    %c0_43 = arith.constant 0 : index
    %205 = vector.load %arg1[%c576, %c0_43] : memref<584x128xf32, #tpu.memory_space<vmem>>, vector<1x128xf32>
    %cst_44 = arith.constant dense<0.000000e+00> : vector<2x128xf32>
    %206 = tpu.matmul %203, %204, %cst_44 {dimension_numbers = #tpu.dot_dimension_numbers<[1], [0], [0], [1], [0, 0, 1, 1], [], []>} : vector<2x128xf32>, vector<128x128xf32>, vector<2x128xf32> -> vector<2x128xf32>
    %207 = vector.broadcast %205 : vector<1x128xf32> to vector<2x128xf32>
    %208 = arith.addf %206, %207 : vector<2x128xf32>
    %c0_45 = arith.constant 0 : index
    %c0_46 = arith.constant 0 : index
    %209 = vector.load %arg2[%c0_45, %c0_46] : memref<2x128xf32, #tpu.memory_space<vmem>>, vector<2x128xf32>
    tpu.vector_store %arg2[%c0_45, %c0_46], %208 {strides = array<i32>} : memref<2x128xf32, #tpu.memory_space<vmem>>, vector<2x128xf32>,
    return
  }
}

</mosaic_0001>

<bundles_post_ra>
// kernel: gru_module_forward.1
= control target key start
LH: loop header
LB: loop body
LE: loop exit
PB: predicated region body
PF: predicated region fallthrough
CT: control target
= control target key end

     0   :  { %7 = vsyncpa [#allocation3], 0  ;;  %s2553_s0 = inlined_call_operand.vmem [shape: f32[16,4], index: 0, kind: input, shape index: {}]   ;;  %s2554_s1 = inlined_call_operand.hbm [shape: f32[584,128], index: 1, kind: input, shape index: {}]   ;;  %s2555_s2 = inlined_call_operand.hbm [shape: f32[2,128], index: 2, kind: output, shape index: {}]  }
   0x1   :  { %8 = vsyncpa [#allocation4], 0  ;;  %s2232_s9 = smov [#allocation2]  }
   0x2   :  { %s16_s10 = sshll.u32 %s2232_s9, 4  ;;  %s17_s10 = int_to_ptr.vmem [resolvable:$true] %s16_s10 }
   0x3   :  { %s2196_s11 = scalar_lea.vmem %s17_s10, 9344  ;;  %p2201_p1 = scmp.lt.s32.totalorder %s17_s10, %s17_s10 }
   0x4   :  { %p2197_p0 = scmp.ne.s32.totalorder %s17_s10, %s2196_s11  ;;  %p2202_p2 = scmp.lt.s32.totalorder %s2196_s11, %s2196_s11 }
   0x6   :  { %p2203_p3 = por %p2202_p2, %p2201_p1 }
   0x8   :  { %p2204_p4 = pnand %p2203_p3, %p2197_p0 }
   0xa   :  { %2207 = shalt.err (!%p2204_p4)
}
   0xb   :  { %s2233_s12 = smov 128   ;;  %s2234_s13 = smov 8  }
   0xc   :  { %22 = dma.hbm_to_vmem [thread:$0]  %s2554_s1, 9344, %s17_s10, [#allocation3], %s2233_s12, %s2233_s12, %s2234_s13  }
   0xd   :  { %2228 = dma.done.wait [#allocation3], 9344  }
   0xe   :  { %2229 = vsyncadd [#allocation3], 4294957952  ;;  %v2235_v0 = vmov 0.0   ;;  %vm2236_vm0 = vmmov 0   ;;  %vm45_vm1 = vcmask 1043456   ;;  %vm38_vm2 = vcmask 31744  }
   0xf   :  { %1901 = vmatprep.subr.mxu1 %v2235_v0  ;;  %1909 = vmatprep.mubr.msk.f32.mxu1 %vm2236_vm0, %v2235_v0  ;;  %v26_v1 = vld [vmem:[#allocation2] sm:$0xf]  ;;  %v33_v4 = vld [vmem:[%s2553_s0 + $0x8] sm:$0xff]  ;;  %v2271_v5 = vld [vmem:[#allocation2 + $0x18] sm:$0xff]  ;;  %v124_v8 = vlaneseq  ;;  %v2237_v15 = vmov 0.5   ;;  %vm139_vm6 = vcmask 1040384  }
  0x10   :  { %v2262_v2 = vld [vmem:[#allocation2 + $0x20] sm:$0xff]  ;;  %1896 = vmatprep.subr.msk.mxu0 %vm45_vm1, %v26_v1  ;;  %v2274_v6 = vld [vmem:[#allocation2 + $0x10] sm:$0xff]  ;;  %v2279_v7 = vld [vmem:[#allocation2 + $0x8] sm:$0xff]  ;;  %s2239_s19 = smov 32   ;;  %vm141_vm7 = vcmask 261120   ;;  %s2240_s20 = smov [#allocation5]  }
  0x11   :  { %v32_v3 = vld [vmem:[%s2553_s0] sm:$0xff]  ;;  %1902 = vmatpush3.msra.mxu1 %v2262_v2  ;;  %1897 = vmatpush3.msk.msra.mxu0 %vm45_vm1, %v26_v1  ;;  %v125_v9 = vand.u32 127, %v124_v8  ;;  %v1757_v10 = vld [vmem:[#allocation2 + $0x28] ss:$0 sm:$0xff]  ;;  %s2238_s0 = smov 64   ;;  %v238_v55 = vld [vmem:[#allocation2 + $0x38] sm:$0xff] }
  0x12   :  { %1898 = vmatprep.mubr.msk.f32.mxu0 %vm38_vm2, %v32_v3  ;;  %1903 = vmatprep.subr.mxu1 %v2235_v0  ;;  %v240_v53 = vld [vmem:[#allocation2 + $0x48] sm:$0xff]  ;;  %v239_v54 = vld [vmem:[#allocation2 + $0x40] sm:$0xff]  ;;  %v237_v56 = vld [vmem:[#allocation2 + $0x30] sm:$0xff]  ;;  %s1748_s21 = sshll.u32 %s2240_s20, 4  ;;  %s1749_s21 = int_to_ptr.vmem [resolvable:$true] %s1748_s21 }
  0x13   :  { %1899 = vmatmul.mubr.msk.f32.vlgmr.msra.gmra.mxu0 %vm38_vm2, %v33_v4  ;;  %1904 = vmatpush3.msra.mxu1 %v2271_v5  ;;  %vm126_vm3 = vcmp.ge.s32.totalorder %v125_v9, 64  ;;  %vm127_vm4 = vcmp.lt.s32.totalorder %v125_v9, 96  ;;  %s2208_s22 = scalar_lea.vmem %s1749_s21, 32  ;;  %p2213_p6 = scmp.lt.s32.totalorder %s1749_s21, %s1749_s21 }
  0x14   :  { %1912 = vmatprep.subr.mxu0 %v2235_v0  ;;  %1905 = vmatprep.subr.mxu1 %v2235_v0  ;;  %vm2298_vm5 = vmand %vm126_vm3, %vm127_vm4  ;;  %p2209_p5 = scmp.ne.s32.totalorder %s1749_s21, %s2208_s22  ;;  %p2214_p7 = scmp.lt.s32.totalorder %s2208_s22, %s2208_s22 }
  0x15   :  { %1920 = vmatprep.mubr.msk.f32.mxu0 %vm2236_vm0, %v2235_v0  ;;  %1906 = vmatpush3.msra.mxu1 %v2274_v6  ;;  %v2304_v16 = vsel %vm2298_vm5, 1.0, %v2237_v15  ;;  %v2329_v45 = vsel %vm2298_vm5, 0.0, %v2237_v15 }
  0x16   :  { %1907 = vmatprep.subr.mxu1 %v2235_v0  ;;  %1913 = vmatpush3.msra.mxu0 %v240_v53  ;;  %p2215_p8 = por %p2214_p7, %p2213_p6 }
  0x17   :  { %1908 = vmatpush3.msra.mxu1 %v2279_v7  ;;  %1914 = vmatprep.subr.mxu0 %v2235_v0 }
  0x18   :  { %1910 = vmatmul.mubr.f32.vlgmr.msra.gmra.mxu1 %v2235_v0  ;;  %1923 = vmatprep.subr.mxu1 %v2235_v0  ;;  %p2216_p9 = pnand %p2215_p8, %p2209_p5 }
  0x19   :  { %1924 = vmatpush3.msra.mxu1 %v2262_v2  ;;  %1931 = vmatprep.mubr.msk.f32.mxu1 %vm2236_vm0, %v2235_v0 }
  0x1a   :  { %1925 = vmatprep.subr.mxu1 %v2235_v0  ;;  %1915 = vmatpush3.msra.mxu0 %v239_v54 }
  0x1b   :  { %1926 = vmatpush3.msra.mxu1 %v2271_v5  ;;  %1916 = vmatprep.subr.mxu0 %v2235_v0 }
  0x1c   :  { %1927 = vmatprep.subr.mxu1 %v2235_v0  ;;  %1917 = vmatpush3.msra.mxu0 %v238_v55 }
  0x1d   :  { %1928 = vmatpush3.msra.mxu1 %v2274_v6  ;;  %1918 = vmatprep.subr.mxu0 %v2235_v0 }
  0x1e   :  { %1929 = vmatprep.subr.mxu1 %v2235_v0  ;;  %1919 = vmatpush3.msra.mxu0 %v237_v56 }
  0x1f   :  { %1930 = vmatpush3.msra.mxu1 %v2279_v7  ;;  %1934 = vmatprep.subr.mxu0 %v2235_v0 }
  0x20   :  { %1945 = vmatprep.subr.mxu1 %v2235_v0 }
  0xd3   :  { %v1900_v12 = vpop.f32.mrf.mxu0 }
  0xd4   :  { %v121_v13 = vadd.f32 %v1900_v12, %v1757_v10 }
  0xd5   :  { %v115_v14 = vpop.f32.mrf.mxu0 }
  0xd6   :  { %v116_v17 = vadd.f32 %v1757_v10, %v115_v14  ;;  %v137_v18 = vrot.slane %v121_v13, 7  ;;  %v495_v19 = vrot.slane %v121_v13, 1  ;;  %v672_v20 = vrot.slane %v121_v13, 2 }
  0xd7   :  { %v849_v21 = vrot.slane %v121_v13, 3  ;;  %v1026_v22 = vrot.slane %v121_v13, 4  ;;  %v1203_v23 = vrot.slane %v121_v13, 5  ;;  %v1380_v24 = vrot.slane %v121_v13, 6 }
  0xd8   :  { %v140_v25 = vsel %vm139_vm6, %v116_v17, %v137_v18  ;;  %v318_v26 = vrot.slane %v116_v17, 1  ;;  %v493_v27 = vrot.slane %v116_v17, 2  ;;  %v670_v28 = vrot.slane %v116_v17, 3  ;;  %v211_v29 = vpop.f32.mrf.mxu1  ;;  %v415_v18 = vld [vmem:[#allocation2 + $0x60] sm:$0xff] }
  0xd9   :  { %v847_v30 = vrot.slane %v116_v17, 4  ;;  %v1024_v31 = vrot.slane %v116_v17, 5  ;;  %v1201_v32 = vrot.slane %v116_v17, 6  ;;  %v1378_v33 = vrot.slane %v116_v17, 7  ;;  %v416_v17 = vld [vmem:[#allocation2 + $0x68] sm:$0xff] }
  0xda   :  { %v215_v34 = vadd.f32 %v211_v29, %v140_v25  ;;  %v320_v35 = vsel %vm139_vm6, %v318_v26, %v121_v13  ;;  %v2309_v36 = vsel %vm139_vm6, %v493_v27, %v495_v19  ;;  %v2312_v37 = vsel %vm139_vm6, %v670_v28, %v672_v20  ;;  %v1911_v38 = vpop.f32.mrf.mxu1  ;;  %v414_v19 = vld [vmem:[#allocation2 + $0x58] sm:$0xff]  ;;  %v1761_v25 = vld [vmem:[#allocation2 + $0x130] ss:$0 sm:$0xff] }
  0xdb   :  { %v2315_v39 = vsel %vm139_vm6, %v847_v30, %v849_v21  ;;  %v2318_v40 = vsel %vm139_vm6, %v1024_v31, %v1026_v22  ;;  %v2321_v41 = vsel %vm139_vm6, %v1201_v32, %v1203_v23  ;;  %v2324_v42 = vsel %vm139_vm6, %v1378_v33, %v1380_v24  ;;  %v413_v21 = vld [vmem:[#allocation2 + $0x50] sm:$0xff] }
  0xdc   :  { %v216_v43 = vmul.f32 %v215_v34, %v2304_v16 }
  0xde   :  { %2156 = vtanh.f32 %v216_v43 }
  0xeb   :  { %v2157_v44 = vpop.eup %2156 }
  0xec   :  { %v218_v46 = vmul.f32 %v2157_v44, %v2304_v16 }
  0xee   :  { %v219_v47 = vadd.f32 %v218_v46, %v2329_v45 }
  0xf0   :  { %222 = vrot.lane.b32.xlu0 %v219_v47, %s2238_s0  ;;  %v220_v50 = vmul.f32 0.0, %v219_v47 }
 0x162   :  { %v223_v48 = vpop.permute.xlu0 %222 }
 0x163   :  { %v225_v49 = vmul.f32 %v223_v48, %v219_v47 }
 0x165   :  { %227 = vrot.lane.b32.xlu0 %v225_v49, %s2239_s19  ;;  %v592_v49 = vld [vmem:[#allocation2 + $0x80] sm:$0xff] }
 0x1d7   :  { %v228_v51 = vpop.permute.xlu0 %227 }
 0x1d8   :  { %v230_v52 = vadd.f32 %v228_v51, %v220_v50  ;;  %v591_v50 = vld [vmem:[#allocation2 + $0x78] sm:$0xff] }
 0x1da   :  { %2158 = vtanh.f32 %v230_v52 }
 0x1e7   :  { %v2159_v57 = vpop.eup %2158 }
 0x1e8   :  { %233 = vrot.lane.b32.xlu1 %v2159_v57, %s2238_s0 }
 0x25a   :  { %v234_v58 = vpop.permute.xlu1 %233 }
 0x25b   :  { %v236_v59 = vmul.f32 %v234_v58, %v219_v47 }
 0x25d   :  { %242 = vrot.lane.b32.xlu1 %v236_v59, %s2239_s19 }
 0x2cf   :  { %v243_v60 = vpop.permute.xlu1 %242 }
 0x2d0   :  { %1921 = vmatmul.mubr.msk.f32.vlgmr.msra.gmra.mxu0 %vm141_vm7, %v243_v60  ;;  %1932 = vmatmul.mubr.msk.f32.vlgmr.msra.gmra.mxu1 %vm141_vm7, %v243_v60 }
 0x2d1   :  { %1946 = vmatpush3.msra.mxu1 %v2262_v2  ;;  %1953 = vmatprep.mubr.msk.f32.mxu1 %vm2236_vm0, %v2235_v0 }
 0x2d2   :  { %1947 = vmatprep.subr.mxu1 %v2235_v0  ;;  %1942 = vmatprep.mubr.msk.f32.mxu0 %vm2236_vm0, %v2235_v0 }
 0x2d3   :  { %1948 = vmatpush3.msra.mxu1 %v2271_v5  ;;  %1935 = vmatpush3.msra.mxu0 %v416_v17 }
 0x2d4   :  { %1949 = vmatprep.subr.mxu1 %v2235_v0  ;;  %1936 = vmatprep.subr.mxu0 %v2235_v0 }
 0x2d5   :  { %1950 = vmatpush3.msra.mxu1 %v2274_v6  ;;  %1937 = vmatpush3.msra.mxu0 %v415_v18 }
 0x2d6   :  { %1951 = vmatprep.subr.mxu1 %v2235_v0  ;;  %1938 = vmatprep.subr.mxu0 %v2235_v0 }
 0x2d7   :  { %1952 = vmatpush3.msra.mxu1 %v2279_v7  ;;  %1939 = vmatpush3.msra.mxu0 %v414_v19 }
 0x2d8   :  { %1967 = vmatprep.subr.mxu1 %v2235_v0  ;;  %1940 = vmatprep.subr.mxu0 %v2235_v0 }
 0x2d9   :  { %1941 = vmatpush3.msra.mxu0 %v413_v21 }
 0x2da   :  { %1956 = vmatprep.subr.mxu0 %v2235_v0 }
 0x390   :  { %v312_v61 = vpop.f32.mrf.mxu0  ;;  %v387_v62 = vpop.f32.mrf.mxu1 }
 0x391   :  { %v391_v63 = vadd.f32 %v387_v62, %v320_v35  ;;  %v316_v26 = vadd.f32 %v1761_v25, %v312_v61 }
 0x392   :  { %v1922_v1 = vpop.f32.mrf.mxu0  ;;  %v1933_v3 = vpop.f32.mrf.mxu1 }
 0x393   :  { %v392_v4 = vmul.f32 %v391_v63, %v2304_v16 }
 0x395   :  { %2160 = vtanh.f32 %v392_v4 }
 0x3a2   :  { %v2161_v8 = vpop.eup %2160 }
 0x3a3   :  { %v394_v9 = vmul.f32 %v2161_v8, %v2304_v16 }
 0x3a5   :  { %v395_v10 = vadd.f32 %v394_v9, %v2329_v45 }
 0x3a7   :  { %398 = vrot.lane.b32.xlu0 %v395_v10, %s2238_s0  ;;  %v396_v13 = vmul.f32 %v395_v10, %v230_v52  ;;  %v590_v52 = vld [vmem:[#allocation2 + $0x70] sm:$0xff] }
 0x419   :  { %v399_v11 = vpop.permute.xlu0 %398 }
 0x41a   :  { %v401_v12 = vmul.f32 %v399_v11, %v395_v10 }
 0x41c   :  { %403 = vrot.lane.b32.xlu1 %v401_v12, %s2239_s19  ;;  %v769_v12 = vld [vmem:[#allocation2 + $0xa0] sm:$0xff] }
 0x48e   :  { %v404_v14 = vpop.permute.xlu1 %403 }
 0x48f   :  { %v406_v15 = vadd.f32 %v404_v14, %v396_v13  ;;  %v768_v13 = vld [vmem:[#allocation2 + $0x98] sm:$0xff] }
 0x491   :  { %2162 = vtanh.f32 %v406_v15 }
 0x49e   :  { %v2163_v20 = vpop.eup %2162 }
 0x49f   :  { %409 = vrot.lane.b32.xlu0 %v2163_v20, %s2238_s0 }
 0x511   :  { %v410_v22 = vpop.permute.xlu0 %409 }
 0x512   :  { %v412_v23 = vmul.f32 %v410_v22, %v395_v10 }
 0x514   :  { %418 = vrot.lane.b32.xlu1 %v412_v23, %s2239_s19 }
 0x586   :  { %v419_v24 = vpop.permute.xlu1 %418 }
 0x587   :  { %1943 = vmatmul.mubr.msk.f32.vlgmr.msra.gmra.mxu0 %vm141_vm7, %v419_v24  ;;  %1954 = vmatmul.mubr.msk.f32.vlgmr.msra.gmra.mxu1 %vm141_vm7, %v419_v24 }
 0x588   :  { %1968 = vmatpush3.msra.mxu1 %v2262_v2  ;;  %1975 = vmatprep.mubr.msk.f32.mxu1 %vm2236_vm0, %v2235_v0 }
 0x589   :  { %1969 = vmatprep.subr.mxu1 %v2235_v0  ;;  %1964 = vmatprep.mubr.msk.f32.mxu0 %vm2236_vm0, %v2235_v0 }
 0x58a   :  { %1970 = vmatpush3.msra.mxu1 %v2271_v5 }
 0x58b   :  { %1971 = vmatprep.subr.mxu1 %v2235_v0 }
 0x58c   :  { %1972 = vmatpush3.msra.mxu1 %v2274_v6 }
 0x58d   :  { %1973 = vmatprep.subr.mxu1 %v2235_v0 }
 0x58e   :  { %1974 = vmatpush3.msra.mxu1 %v2279_v7 }
 0x58f   :  { %1989 = vmatprep.subr.mxu1 %v2235_v0 }
 0x647   :  { %v488_v27 = vpop.f32.mrf.mxu0  ;;  %v564_v28 = vpop.f32.mrf.mxu1 }
 0x648   :  { %v492_v29 = vadd.f32 %v488_v27, %v316_v26  ;;  %v568_v30 = vadd.f32 %v564_v28, %v2309_v36  ;;  %v593_v36 = vld [vmem:[#allocation2 + $0x88] sm:$0xff] }
 0x649   :  { %v1944_v31 = vpop.f32.mrf.mxu0  ;;  %v1955_v32 = vpop.f32.mrf.mxu1  ;;  %1957 = vmatpush3.msra.mxu0 %v593_v36 }
 0x64a   :  { %v569_v33 = vmul.f32 %v568_v30, %v2304_v16  ;;  %1958 = vmatprep.subr.mxu0 %v2235_v0 }
 0x64b   :  { %1959 = vmatpush3.msra.mxu0 %v592_v49 }
 0x64c   :  { %2164 = vtanh.f32 %v569_v33  ;;  %1960 = vmatprep.subr.mxu0 %v2235_v0 }
 0x64d   :  { %1961 = vmatpush3.msra.mxu0 %v591_v50 }
 0x64e   :  { %1962 = vmatprep.subr.mxu0 %v2235_v0 }
 0x64f   :  { %1963 = vmatpush3.msra.mxu0 %v590_v52 }
 0x650   :  { %1978 = vmatprep.subr.mxu0 %v2235_v0 }
 0x659   :  { %v2165_v34 = vpop.eup %2164 }
 0x65a   :  { %v571_v35 = vmul.f32 %v2165_v34, %v2304_v16 }
 0x65c   :  { %v572_v38 = vadd.f32 %v571_v35, %v2329_v45  ;;  %v946_v35 = vld [vmem:[#allocation2 + $0xc0] sm:$0xff] }
 0x65e   :  { %575 = vrot.lane.b32.xlu0 %v572_v38, %s2238_s0  ;;  %v573_v46 = vmul.f32 %v572_v38, %v406_v15  ;;  %v767_v15 = vld [vmem:[#allocation2 + $0x90] sm:$0xff] }
 0x6d0   :  { %v576_v43 = vpop.permute.xlu0 %575 }
 0x6d1   :  { %v578_v44 = vmul.f32 %v576_v43, %v572_v38 }
 0x6d3   :  { %580 = vrot.lane.b32.xlu1 %v578_v44, %s2239_s19  ;;  %v944_v44 = vld [vmem:[#allocation2 + $0xb0] sm:$0xff] }
 0x745   :  { %v581_v47 = vpop.permute.xlu1 %580 }
 0x746   :  { %v583_v48 = vadd.f32 %v581_v47, %v573_v46 }
 0x748   :  { %2166 = vtanh.f32 %v583_v48 }
 0x755   :  { %v2167_v51 = vpop.eup %2166 }
 0x756   :  { %586 = vrot.lane.b32.xlu0 %v2167_v51, %s2238_s0 }
 0x7c8   :  { %v587_v53 = vpop.permute.xlu0 %586 }
 0x7c9   :  { %v589_v54 = vmul.f32 %v587_v53, %v572_v38  ;;  %v945_v38 = vld [vmem:[#allocation2 + $0xb8] sm:$0xff] }
 0x7cb   :  { %595 = vrot.lane.b32.xlu1 %v589_v54, %s2239_s19 }
 0x83d   :  { %v596_v55 = vpop.permute.xlu1 %595 }
 0x83e   :  { %1965 = vmatmul.mubr.msk.f32.vlgmr.msra.gmra.mxu0 %vm141_vm7, %v596_v55  ;;  %1976 = vmatmul.mubr.msk.f32.vlgmr.msra.gmra.mxu1 %vm141_vm7, %v596_v55 }
 0x83f   :  { %1990 = vmatpush3.msra.mxu1 %v2262_v2  ;;  %1997 = vmatprep.mubr.msk.f32.mxu1 %vm2236_vm0, %v2235_v0 }
 0x840   :  { %1991 = vmatprep.subr.mxu1 %v2235_v0  ;;  %1986 = vmatprep.mubr.msk.f32.mxu0 %vm2236_vm0, %v2235_v0 }
 0x841   :  { %1992 = vmatpush3.msra.mxu1 %v2271_v5 }
 0x842   :  { %1993 = vmatprep.subr.mxu1 %v2235_v0 }
 0x843   :  { %1994 = vmatpush3.msra.mxu1 %v2274_v6 }
 0x844   :  { %1995 = vmatprep.subr.mxu1 %v2235_v0 }
 0x845   :  { %1996 = vmatpush3.msra.mxu1 %v2279_v7 }
 0x846   :  { %2011 = vmatprep.subr.mxu1 %v2235_v0 }
 0x8fe   :  { %v665_v56 = vpop.f32.mrf.mxu0  ;;  %v741_v57 = vpop.f32.mrf.mxu1 }
 0x8ff   :  { %v669_v58 = vadd.f32 %v665_v56, %v492_v29  ;;  %v745_v59 = vadd.f32 %v741_v57, %v2312_v37  ;;  %v770_v37 = vld [vmem:[#allocation2 + $0xa8] sm:$0xff] }
 0x900   :  { %v1966_v60 = vpop.f32.mrf.mxu0  ;;  %v1977_v61 = vpop.f32.mrf.mxu1  ;;  %1979 = vmatpush3.msra.mxu0 %v770_v37 }
 0x901   :  { %v746_v62 = vmul.f32 %v745_v59, %v2304_v16  ;;  %1980 = vmatprep.subr.mxu0 %v2235_v0 }
 0x902   :  { %1981 = vmatpush3.msra.mxu0 %v769_v12 }
 0x903   :  { %2168 = vtanh.f32 %v746_v62  ;;  %1982 = vmatprep.subr.mxu0 %v2235_v0 }
 0x904   :  { %1983 = vmatpush3.msra.mxu0 %v768_v13 }
 0x905   :  { %1984 = vmatprep.subr.mxu0 %v2235_v0 }
 0x906   :  { %1985 = vmatpush3.msra.mxu0 %v767_v15 }
 0x907   :  { %2000 = vmatprep.subr.mxu0 %v2235_v0 }
 0x910   :  { %v2169_v63 = vpop.eup %2168 }
 0x911   :  { %v748_v1 = vmul.f32 %v2169_v63, %v2304_v16  ;;  %v1123_v63 = vld [vmem:[#allocation2 + $0xe0] sm:$0xff] }
 0x913   :  { %v749_v3 = vadd.f32 %v748_v1, %v2329_v45  ;;  %v1122_v1 = vld [vmem:[#allocation2 + $0xd8] sm:$0xff] }
 0x915   :  { %752 = vrot.lane.b32.xlu0 %v749_v3, %s2238_s0  ;;  %v750_v9 = vmul.f32 %v749_v3, %v583_v48 }
 0x987   :  { %v753_v4 = vpop.permute.xlu0 %752 }
 0x988   :  { %v755_v8 = vmul.f32 %v753_v4, %v749_v3  ;;  %v1121_v4 = vld [vmem:[#allocation2 + $0xd0] sm:$0xff] }
 0x98a   :  { %757 = vrot.lane.b32.xlu1 %v755_v8, %s2239_s19 }
 0x9fc   :  { %v758_v10 = vpop.permute.xlu1 %757 }
 0x9fd   :  { %v760_v11 = vadd.f32 %v758_v10, %v750_v9 }
 0x9ff   :  { %2170 = vtanh.f32 %v760_v11 }
 0xa0c   :  { %v2171_v14 = vpop.eup %2170 }
 0xa0d   :  { %763 = vrot.lane.b32.xlu0 %v2171_v14, %s2238_s0 }
 0xa7f   :  { %v764_v17 = vpop.permute.xlu0 %763 }
 0xa80   :  { %v766_v18 = vmul.f32 %v764_v17, %v749_v3 }
 0xa82   :  { %772 = vrot.lane.b32.xlu1 %v766_v18, %s2239_s19 }
 0xaf4   :  { %v773_v19 = vpop.permute.xlu1 %772 }
 0xaf5   :  { %1987 = vmatmul.mubr.msk.f32.vlgmr.msra.gmra.mxu0 %vm141_vm7, %v773_v19  ;;  %1998 = vmatmul.mubr.msk.f32.vlgmr.msra.gmra.mxu1 %vm141_vm7, %v773_v19 }
 0xaf6   :  { %2012 = vmatpush3.msra.mxu1 %v2262_v2  ;;  %2019 = vmatprep.mubr.msk.f32.mxu1 %vm2236_vm0, %v2235_v0 }
 0xaf7   :  { %2013 = vmatprep.subr.mxu1 %v2235_v0  ;;  %2008 = vmatprep.mubr.msk.f32.mxu0 %vm2236_vm0, %v2235_v0 }
 0xaf8   :  { %2014 = vmatpush3.msra.mxu1 %v2271_v5 }
 0xaf9   :  { %2015 = vmatprep.subr.mxu1 %v2235_v0 }
 0xafa   :  { %2016 = vmatpush3.msra.mxu1 %v2274_v6 }
 0xafb   :  { %2017 = vmatprep.subr.mxu1 %v2235_v0 }
 0xafc   :  { %2018 = vmatpush3.msra.mxu1 %v2279_v7 }
 0xafd   :  { %2033 = vmatprep.subr.mxu1 %v2235_v0 }
 0xbb5   :  { %v842_v20 = vpop.f32.mrf.mxu0  ;;  %v918_v21 = vpop.f32.mrf.mxu1 }
 0xbb6   :  { %v846_v22 = vadd.f32 %v842_v20, %v669_v58  ;;  %v922_v23 = vadd.f32 %v918_v21, %v2315_v39  ;;  %v947_v39 = vld [vmem:[#allocation2 + $0xc8] sm:$0xff] }
 0xbb7   :  { %v1988_v24 = vpop.f32.mrf.mxu0  ;;  %v1999_v25 = vpop.f32.mrf.mxu1  ;;  %2001 = vmatpush3.msra.mxu0 %v947_v39 }
 0xbb8   :  { %v923_v26 = vmul.f32 %v922_v23, %v2304_v16  ;;  %2002 = vmatprep.subr.mxu0 %v2235_v0  ;;  %v1299_v23 = vld [vmem:[#allocation2 + $0xf8] sm:$0xff]  ;;  %v1298_v25 = vld [vmem:[#allocation2 + $0xf0] sm:$0xff] }
 0xbb9   :  { %2003 = vmatpush3.msra.mxu0 %v946_v35 }
 0xbba   :  { %2172 = vtanh.f32 %v923_v26  ;;  %2004 = vmatprep.subr.mxu0 %v2235_v0 }
 0xbbb   :  { %2005 = vmatpush3.msra.mxu0 %v945_v38 }
 0xbbc   :  { %2006 = vmatprep.subr.mxu0 %v2235_v0 }
 0xbbd   :  { %2007 = vmatpush3.msra.mxu0 %v944_v44 }
 0xbbe   :  { %2022 = vmatprep.subr.mxu0 %v2235_v0 }
 0xbc7   :  { %v2173_v27 = vpop.eup %2172 }
 0xbc8   :  { %v925_v28 = vmul.f32 %v2173_v27, %v2304_v16 }
 0xbca   :  { %v926_v29 = vadd.f32 %v925_v28, %v2329_v45 }
 0xbcc   :  { %929 = vrot.lane.b32.xlu0 %v926_v29, %s2238_s0  ;;  %v927_v32 = vmul.f32 %v926_v29, %v760_v11 }
 0xc3e   :  { %v930_v30 = vpop.permute.xlu0 %929 }
 0xc3f   :  { %v932_v31 = vmul.f32 %v930_v30, %v926_v29 }
 0xc41   :  { %934 = vrot.lane.b32.xlu1 %v932_v31, %s2239_s19 }
 0xcb3   :  { %v935_v33 = vpop.permute.xlu1 %934 }
 0xcb4   :  { %v937_v34 = vadd.f32 %v935_v33, %v927_v32 }
 0xcb6   :  { %2174 = vtanh.f32 %v937_v34 }
 0xcc3   :  { %v2175_v43 = vpop.eup %2174 }
 0xcc4   :  { %940 = vrot.lane.b32.xlu0 %v2175_v43, %s2238_s0 }
 0xd36   :  { %v941_v46 = vpop.permute.xlu0 %940 }
 0xd37   :  { %v943_v47 = vmul.f32 %v941_v46, %v926_v29 }
 0xd39   :  { %949 = vrot.lane.b32.xlu1 %v943_v47, %s2239_s19 }
 0xdab   :  { %v950_v48 = vpop.permute.xlu1 %949 }
 0xdac   :  { %2009 = vmatmul.mubr.msk.f32.vlgmr.msra.gmra.mxu0 %vm141_vm7, %v950_v48  ;;  %2020 = vmatmul.mubr.msk.f32.vlgmr.msra.gmra.mxu1 %vm141_vm7, %v950_v48 }
 0xdad   :  { %2034 = vmatpush3.msra.mxu1 %v2262_v2  ;;  %2041 = vmatprep.mubr.msk.f32.mxu1 %vm2236_vm0, %v2235_v0 }
 0xdae   :  { %2035 = vmatprep.subr.mxu1 %v2235_v0  ;;  %2030 = vmatprep.mubr.msk.f32.mxu0 %vm2236_vm0, %v2235_v0 }
 0xdaf   :  { %2036 = vmatpush3.msra.mxu1 %v2271_v5 }
 0xdb0   :  { %2037 = vmatprep.subr.mxu1 %v2235_v0 }
 0xdb1   :  { %2038 = vmatpush3.msra.mxu1 %v2274_v6 }
 0xdb2   :  { %2039 = vmatprep.subr.mxu1 %v2235_v0 }
 0xdb3   :  { %2040 = vmatpush3.msra.mxu1 %v2279_v7 }
 0xdb4   :  { %2055 = vmatprep.subr.mxu1 %v2235_v0 }
 0xe6c   :  { %v1019_v36 = vpop.f32.mrf.mxu0  ;;  %v1095_v49 = vpop.f32.mrf.mxu1 }
 0xe6d   :  { %v1023_v50 = vadd.f32 %v1019_v36, %v846_v22  ;;  %v1099_v51 = vadd.f32 %v1095_v49, %v2318_v40  ;;  %v1124_v40 = vld [vmem:[#allocation2 + $0xe8] sm:$0xff]  ;;  %v1300_v22 = vld [vmem:[#allocation2 + $0x100] sm:$0xff] }
 0xe6e   :  { %v2010_v52 = vpop.f32.mrf.mxu0  ;;  %v2021_v53 = vpop.f32.mrf.mxu1  ;;  %2023 = vmatpush3.msra.mxu0 %v1124_v40  ;;  %v1477_v49 = vld [vmem:[#allocation2 + $0x120] sm:$0xff] }
 0xe6f   :  { %v1100_v54 = vmul.f32 %v1099_v51, %v2304_v16  ;;  %2024 = vmatprep.subr.mxu0 %v2235_v0  ;;  %v1571_v51 = vld [vmem:[#allocation2 + $0x1b0] sm:$0xff]  ;;  %v1570_v52 = vld [vmem:[#allocation2 + $0x1a8] sm:$0xff]  ;;  %v1569_v53 = vld [vmem:[#allocation2 + $0x1a0] sm:$0xff] }
 0xe70   :  { %2025 = vmatpush3.msra.mxu0 %v1123_v63  ;;  %v1561_v40 = vld [vmem:[#allocation2 + $0x160] sm:$0xff]  ;;  %v1560_v63 = vld [vmem:[#allocation2 + $0x158] sm:$0xff] }
 0xe71   :  { %2176 = vtanh.f32 %v1100_v54  ;;  %2026 = vmatprep.subr.mxu0 %v2235_v0  ;;  %v1568_v54 = vld [vmem:[#allocation2 + $0x198] sm:$0xff] }
 0xe72   :  { %2027 = vmatpush3.msra.mxu0 %v1122_v1  ;;  %v1559_v1 = vld [vmem:[#allocation2 + $0x150] sm:$0xff] }
 0xe73   :  { %2028 = vmatprep.subr.mxu0 %v2235_v0 }
 0xe74   :  { %2029 = vmatpush3.msra.mxu0 %v1121_v4  ;;  %v1558_v4 = vld [vmem:[#allocation2 + $0x148] sm:$0xff] }
 0xe75   :  { %2044 = vmatprep.subr.mxu0 %v2235_v0 }
 0xe7e   :  { %v2177_v55 = vpop.eup %2176 }
 0xe7f   :  { %v1102_v56 = vmul.f32 %v2177_v55, %v2304_v16  ;;  %v1567_v55 = vld [vmem:[#allocation2 + $0x190] sm:$0xff] }
 0xe81   :  { %v1103_v57 = vadd.f32 %v1102_v56, %v2329_v45  ;;  %v1566_v56 = vld [vmem:[#allocation2 + $0x188] sm:$0xff] }
 0xe83   :  { %1106 = vrot.lane.b32.xlu0 %v1103_v57, %s2238_s0  ;;  %v1104_v60 = vmul.f32 %v1103_v57, %v937_v34 }
 0xef5   :  { %v1107_v58 = vpop.permute.xlu0 %1106 }
 0xef6   :  { %v1109_v59 = vmul.f32 %v1107_v58, %v1103_v57  ;;  %v1565_v58 = vld [vmem:[#allocation2 + $0x180] sm:$0xff] }
 0xef8   :  { %1111 = vrot.lane.b32.xlu1 %v1109_v59, %s2239_s19 }
 0xf6a   :  { %v1112_v61 = vpop.permute.xlu1 %1111 }
 0xf6b   :  { %v1114_v62 = vadd.f32 %v1112_v61, %v1104_v60  ;;  %v1564_v60 = vld [vmem:[#allocation2 + $0x178] sm:$0xff]  ;;  %v1563_v61 = vld [vmem:[#allocation2 + $0x170] sm:$0xff] }
 0xf6d   :  { %2178 = vtanh.f32 %v1114_v62 }
 0xf7a   :  { %v2179_v3 = vpop.eup %2178 }
 0xf7b   :  { %1117 = vrot.lane.b32.xlu0 %v2179_v3, %s2238_s0 }
 0xfed   :  { %v1118_v8 = vpop.permute.xlu0 %1117 }
 0xfee   :  { %v1120_v9 = vmul.f32 %v1118_v8, %v1103_v57  ;;  %v1557_v8 = vld [vmem:[#allocation2 + $0x140] sm:$0xff] }
 0xff0   :  { %1126 = vrot.lane.b32.xlu1 %v1120_v9, %s2239_s19  ;;  %v1556_v9 = vld [vmem:[#allocation2 + $0x138] sm:$0xff] }
0x1062   :  { %v1127_v10 = vpop.permute.xlu1 %1126 }
0x1063   :  { %2031 = vmatmul.mubr.msk.f32.vlgmr.msra.gmra.mxu0 %vm141_vm7, %v1127_v10  ;;  %2042 = vmatmul.mubr.msk.f32.vlgmr.msra.gmra.mxu1 %vm141_vm7, %v1127_v10  ;;  %v1665_v10 = vld [vmem:[#allocation2 + $0x238] sm:$0xff] }
0x1064   :  { %2056 = vmatpush3.msra.mxu1 %v2262_v2  ;;  %2063 = vmatprep.mubr.msk.f32.mxu1 %vm2236_vm0, %v2235_v0 }
0x1065   :  { %2057 = vmatprep.subr.mxu1 %v2235_v0  ;;  %2052 = vmatprep.mubr.msk.f32.mxu0 %vm2236_vm0, %v2235_v0 }
0x1066   :  { %2058 = vmatpush3.msra.mxu1 %v2271_v5 }
0x1067   :  { %2059 = vmatprep.subr.mxu1 %v2235_v0 }
0x1068   :  { %2060 = vmatpush3.msra.mxu1 %v2274_v6 }
0x1069   :  { %2061 = vmatprep.subr.mxu1 %v2235_v0 }
0x106a   :  { %2062 = vmatpush3.msra.mxu1 %v2279_v7 }
0x106b   :  { %2077 = vmatprep.subr.mxu1 %v2235_v0 }
0x1123   :  { %v1196_v2 = vpop.f32.mrf.mxu0  ;;  %v1272_v11 = vpop.f32.mrf.mxu1 }
0x1124   :  { %v1200_v37 = vadd.f32 %v1196_v2, %v1023_v50  ;;  %v1276_v12 = vadd.f32 %v1272_v11, %v2321_v41  ;;  %v1301_v41 = vld [vmem:[#allocation2 + $0x108] sm:$0xff]  ;;  %v1476_v50 = vld [vmem:[#allocation2 + $0x118] sm:$0xff]  ;;  %v1664_v2 = vld [vmem:[#allocation2 + $0x230] sm:$0xff] }
0x1125   :  { %v2032_v13 = vpop.f32.mrf.mxu0  ;;  %v2043_v14 = vpop.f32.mrf.mxu1  ;;  %2045 = vmatpush3.msra.mxu0 %v1301_v41  ;;  %v1663_v11 = vld [vmem:[#allocation2 + $0x228] sm:$0xff] }
0x1126   :  { %v1277_v15 = vmul.f32 %v1276_v12, %v2304_v16  ;;  %2046 = vmatprep.subr.mxu0 %v2235_v0  ;;  %v1661_v12 = vld [vmem:[#allocation2 + $0x218] sm:$0xff]  ;;  %v1660_v13 = vld [vmem:[#allocation2 + $0x210] sm:$0xff]  ;;  %v1659_v14 = vld [vmem:[#allocation2 + $0x208] sm:$0xff] }
0x1127   :  { %2047 = vmatpush3.msra.mxu0 %v1300_v22  ;;  %v1652_v22 = vld [vmem:[#allocation2 + $0x1d0] sm:$0xff] }
0x1128   :  { %2180 = vtanh.f32 %v1277_v15  ;;  %2048 = vmatprep.subr.mxu0 %v2235_v0  ;;  %v1658_v15 = vld [vmem:[#allocation2 + $0x200] sm:$0xff] }
0x1129   :  { %2049 = vmatpush3.msra.mxu0 %v1299_v23  ;;  %v1651_v23 = vld [vmem:[#allocation2 + $0x1c8] sm:$0xff] }
0x112a   :  { %2050 = vmatprep.subr.mxu0 %v2235_v0 }
0x112b   :  { %2051 = vmatpush3.msra.mxu0 %v1298_v25  ;;  %v1777_v25 = vld [vmem:[#allocation2 + $0x1b8] ss:$0 sm:$0xff] }
0x112c   :  { %2066 = vmatprep.subr.mxu0 %v2235_v0 }
0x1135   :  { %v2181_v5 = vpop.eup %2180 }
0x1136   :  { %v1279_v17 = vmul.f32 %v2181_v5, %v2304_v16  ;;  %v1657_v5 = vld [vmem:[#allocation2 + $0x1f8] sm:$0xff] }
0x1138   :  { %v1280_v6 = vadd.f32 %v1279_v17, %v2329_v45  ;;  %v1656_v17 = vld [vmem:[#allocation2 + $0x1f0] sm:$0xff] }
0x113a   :  { %1283 = vrot.lane.b32.xlu0 %v1280_v6, %s2238_s0  ;;  %v1281_v19 = vmul.f32 %v1280_v6, %v1114_v62  ;;  %v1562_v62 = vld [vmem:[#allocation2 + $0x168] sm:$0xff] }
0x11ac   :  { %v1284_v7 = vpop.permute.xlu0 %1283 }
0x11ad   :  { %v1286_v18 = vmul.f32 %v1284_v7, %v1280_v6  ;;  %v1654_v7 = vld [vmem:[#allocation2 + $0x1e0] sm:$0xff] }
0x11af   :  { %1288 = vrot.lane.b32.xlu1 %v1286_v18, %s2239_s19  ;;  %v1653_v18 = vld [vmem:[#allocation2 + $0x1d8] sm:$0xff] }
0x1221   :  { %v1289_v20 = vpop.permute.xlu1 %1288 }
0x1222   :  { %v1291_v21 = vadd.f32 %v1289_v20, %v1281_v19 }
0x1224   :  { %2182 = vtanh.f32 %v1291_v21 }
0x1231   :  { %v2183_v24 = vpop.eup %2182 }
0x1232   :  { %1294 = vrot.lane.b32.xlu0 %v2183_v24, %s2238_s0  ;;  %v1650_v24 = vld [vmem:[#allocation2 + $0x1c0] sm:$0xff] }
0x12a4   :  { %v1295_v26 = vpop.permute.xlu0 %1294 }
0x12a5   :  { %v1297_v27 = vmul.f32 %v1295_v26, %v1280_v6  ;;  %v1655_v6 = vld [vmem:[#allocation2 + $0x1e8] sm:$0xff] }
0x12a7   :  { %1303 = vrot.lane.b32.xlu1 %v1297_v27, %s2239_s19 }
0x1319   :  { %v1304_v28 = vpop.permute.xlu1 %1303 }
0x131a   :  { %2053 = vmatmul.mubr.msk.f32.vlgmr.msra.gmra.mxu0 %vm141_vm7, %v1304_v28  ;;  %2064 = vmatmul.mubr.msk.f32.vlgmr.msra.gmra.mxu1 %vm141_vm7, %v1304_v28 }
0x131b   :  { %2074 = vmatprep.mubr.msk.f32.mxu0 %vm2236_vm0, %v2235_v0  ;;  %2109 = vmatprep.mubr.msk.f32.mxu1 %vm2236_vm0, %v2235_v0 }
0x131c   :  { %2078 = vmatpush3.msra.mxu1 %v1571_v51 }
0x131d   :  { %2079 = vmatprep.subr.mxu1 %v2235_v0 }
0x131e   :  { %2080 = vmatpush3.msra.mxu1 %v1570_v52 }
0x131f   :  { %2081 = vmatprep.subr.mxu1 %v2235_v0 }
0x1320   :  { %2082 = vmatpush3.msra.mxu1 %v1569_v53 }
0x1321   :  { %2083 = vmatprep.subr.mxu1 %v2235_v0 }
0x1322   :  { %2084 = vmatpush3.msra.mxu1 %v1568_v54 }
0x1323   :  { %2085 = vmatprep.subr.mxu1 %v2235_v0 }
0x1324   :  { %2086 = vmatpush3.msra.mxu1 %v1567_v55 }
0x1325   :  { %2087 = vmatprep.subr.mxu1 %v2235_v0 }
0x1326   :  { %2088 = vmatpush3.msra.mxu1 %v1566_v56 }
0x1327   :  { %2089 = vmatprep.subr.mxu1 %v2235_v0 }
0x1328   :  { %2090 = vmatpush3.msra.mxu1 %v1565_v58 }
0x1329   :  { %2091 = vmatprep.subr.mxu1 %v2235_v0 }
0x132a   :  { %2092 = vmatpush3.msra.mxu1 %v1564_v60 }
0x132b   :  { %2093 = vmatprep.subr.mxu1 %v2235_v0 }
0x132c   :  { %2094 = vmatpush3.msra.mxu1 %v1563_v61 }
0x132d   :  { %2095 = vmatprep.subr.mxu1 %v2235_v0 }
0x132e   :  { %2096 = vmatpush3.msra.mxu1 %v1562_v62 }
0x132f   :  { %2097 = vmatprep.subr.mxu1 %v2235_v0 }
0x1330   :  { %2098 = vmatpush3.msra.mxu1 %v1561_v40 }
0x1331   :  { %2099 = vmatprep.subr.mxu1 %v2235_v0 }
0x1332   :  { %2100 = vmatpush3.msra.mxu1 %v1560_v63 }
0x1333   :  { %2101 = vmatprep.subr.mxu1 %v2235_v0 }
0x1334   :  { %2102 = vmatpush3.msra.mxu1 %v1559_v1 }
0x1335   :  { %2103 = vmatprep.subr.mxu1 %v2235_v0 }
0x1336   :  { %2104 = vmatpush3.msra.mxu1 %v1558_v4 }
0x1337   :  { %2105 = vmatprep.subr.mxu1 %v2235_v0 }
0x1338   :  { %2106 = vmatpush3.msra.mxu1 %v1557_v8 }
0x1339   :  { %2107 = vmatprep.subr.mxu1 %v2235_v0 }
0x133a   :  { %2108 = vmatpush3.msra.mxu1 %v1556_v9 }
0x13da   :  { %v1373_v29 = vpop.f32.mrf.mxu0  ;;  %v1449_v30 = vpop.f32.mrf.mxu1 }
0x13db   :  { %v2502_v31 = vadd.f32 %v1373_v29, %v1200_v37  ;;  %v1453_v32 = vadd.f32 %v1449_v30, %v2324_v42  ;;  %v1478_v42 = vld [vmem:[#allocation2 + $0x128] sm:$0xff]  ;;  %v1662_v37 = vld [vmem:[#allocation2 + $0x220] sm:$0xff] }
0x13dc   :  { %v2054_v33 = vpop.f32.mrf.mxu0  ;;  %v2065_v34 = vpop.f32.mrf.mxu1  ;;  %2067 = vmatpush3.msra.mxu0 %v1478_v42 }
0x13dd   :  { %v1454_v39 = vmul.f32 %v1453_v32, %v2304_v16  ;;  %2068 = vmatprep.subr.mxu0 %v2235_v0 }
0x13de   :  { %2069 = vmatpush3.msra.mxu0 %v1477_v49 }
0x13df   :  { %2184 = vtanh.f32 %v1454_v39  ;;  %2070 = vmatprep.subr.mxu0 %v2235_v0 }
0x13e0   :  { %2071 = vmatpush3.msra.mxu0 %v1476_v50 }
0x13e1   :  { %2072 = vmatprep.subr.mxu0 %v2235_v0 }
0x13ec   :  { %v2185_v35 = vpop.eup %2184 }
0x13ed   :  { %v1456_v38 = vmul.f32 %v2185_v35, %v2304_v16 }
0x13ef   :  { %v1457_v43 = vadd.f32 %v1456_v38, %v2329_v45  ;;  %v1475_v45 = vld [vmem:[#allocation2 + $0x110] sm:$0xff] }
0x13f0   :  { %2073 = vmatpush3.msra.mxu0 %v1475_v45 }
0x13f1   :  { %1460 = vrot.lane.b32.xlu0 %v1457_v43, %s2238_s0  ;;  %v1458_v47 = vmul.f32 %v1457_v43, %v1291_v21  ;;  %2112 = vmatprep.subr.mxu0 %v2235_v0 }
0x1463   :  { %v1461_v44 = vpop.permute.xlu0 %1460 }
0x1464   :  { %v1463_v46 = vmul.f32 %v1461_v44, %v1457_v43 }
0x1466   :  { %1465 = vrot.lane.b32.xlu1 %v1463_v46, %s2239_s19 }
0x14d8   :  { %v1466_v48 = vpop.permute.xlu1 %1465 }
0x14d9   :  { %v1468_v36 = vadd.f32 %v1466_v48, %v1458_v47 }
0x14db   :  { %2186 = vtanh.f32 %v1468_v36 }
0x14e8   :  { %v2187_v16 = vpop.eup %2186 }
0x14e9   :  { %1471 = vrot.lane.b32.xlu0 %v2187_v16, %s2238_s0 }
0x155b   :  { %v1472_v57 = vpop.permute.xlu0 %1471 }
0x155c   :  { %v1474_v59 = vmul.f32 %v1472_v57, %v1457_v43 }
0x155e   :  { %1480 = vrot.lane.b32.xlu1 %v1474_v59, %s2239_s19 }
0x15d0   :  { %v1481_v3 = vpop.permute.xlu1 %1480 }
0x15d1   :  { %2075 = vmatmul.mubr.msk.f32.vlgmr.msra.gmra.mxu0 %vm141_vm7, %v1481_v3 }
0x15d2   :  { %2144 = vmatprep.mubr.msk.f32.mxu0 %vm2236_vm0, %v2235_v0  ;;  %2113 = vmatpush3.msra.mxu0 %v1665_v10 }
0x15d3   :  { %2114 = vmatprep.subr.mxu0 %v2235_v0 }
0x15d4   :  { %2115 = vmatpush3.msra.mxu0 %v1664_v2 }
0x15d5   :  { %2116 = vmatprep.subr.mxu0 %v2235_v0 }
0x15d6   :  { %2117 = vmatpush3.msra.mxu0 %v1663_v11 }
0x15d7   :  { %2118 = vmatprep.subr.mxu0 %v2235_v0 }
0x15d8   :  { %2119 = vmatpush3.msra.mxu0 %v1662_v37 }
0x15d9   :  { %2120 = vmatprep.subr.mxu0 %v2235_v0 }
0x15da   :  { %2121 = vmatpush3.msra.mxu0 %v1661_v12 }
0x15db   :  { %2122 = vmatprep.subr.mxu0 %v2235_v0 }
0x15dc   :  { %2123 = vmatpush3.msra.mxu0 %v1660_v13 }
0x15dd   :  { %2124 = vmatprep.subr.mxu0 %v2235_v0 }
0x15de   :  { %2125 = vmatpush3.msra.mxu0 %v1659_v14 }
0x15df   :  { %2126 = vmatprep.subr.mxu0 %v2235_v0 }
0x15e0   :  { %2127 = vmatpush3.msra.mxu0 %v1658_v15 }
0x15e1   :  { %2128 = vmatprep.subr.mxu0 %v2235_v0 }
0x15e2   :  { %2129 = vmatpush3.msra.mxu0 %v1657_v5 }
0x15e3   :  { %2130 = vmatprep.subr.mxu0 %v2235_v0 }
0x15e4   :  { %2131 = vmatpush3.msra.mxu0 %v1656_v17 }
0x15e5   :  { %2132 = vmatprep.subr.mxu0 %v2235_v0 }
0x15e6   :  { %2133 = vmatpush3.msra.mxu0 %v1655_v6 }
0x15e7   :  { %2134 = vmatprep.subr.mxu0 %v2235_v0 }
0x15e8   :  { %2135 = vmatpush3.msra.mxu0 %v1654_v7 }
0x15e9   :  { %2136 = vmatprep.subr.mxu0 %v2235_v0 }
0x15ea   :  { %2137 = vmatpush3.msra.mxu0 %v1653_v18 }
0x15eb   :  { %2138 = vmatprep.subr.mxu0 %v2235_v0 }
0x15ec   :  { %2139 = vmatpush3.msra.mxu0 %v1652_v22 }
0x15ed   :  { %2140 = vmatprep.subr.mxu0 %v2235_v0 }
0x15ee   :  { %2141 = vmatpush3.msra.mxu0 %v1651_v23 }
0x15ef   :  { %2142 = vmatprep.subr.mxu0 %v2235_v0 }
0x15f0   :  { %2143 = vmatpush3.msra.mxu0 %v1650_v24 }
0x1691   :  { %v1550_v19 = vpop.f32.mrf.mxu0 }
0x1692   :  { %v1554_v20 = vadd.f32 %v1550_v19, %v2502_v31  ;;  %v1778_v31 = vld [vmem:[#allocation2 + $0x240] ss:$0 sm:$0xff] }
0x1693   :  { %v2076_v21 = vpop.f32.mrf.mxu0 }
0x1694   :  { %v1555_v41 = vmax.f32 %v1554_v20, 0.0 }
0x1696   :  { %2110 = vmatmul.mubr.f32.vlgmr.msra.gmra.mxu1 %v1555_v41 }
0x1756   :  { %v1643_v26 = vpop.f32.mrf.mxu1 }
0x1757   :  { %v1644_v27 = vadd.f32 %v1777_v25, %v1643_v26 }
0x1758   :  { %v2111_v28 = vpop.f32.mrf.mxu1 }
0x1759   :  { %vm1647_vm8 = vcmp.gt.f32.partialorder %v1644_v27, 0.0  ;;  %v1648_v29 = vmul.f32 0.01, %v1644_v27 }
0x175b   :  { %v1649_v30 = vsel %vm1647_vm8, %v1644_v27, %v1648_v29 }
0x175c   :  { %2145 = vmatmul.mubr.f32.vlgmr.msra.gmra.mxu0 %v1649_v30 }
0x181c   :  { %v1737_v32 = vpop.f32.mrf.mxu0 }
0x181d   :  { %v1738_v33 = vadd.f32 %v1778_v31, %v1737_v32 }
0x181e   :  { %v2146_v34 = vpop.f32.mrf.mxu0 }
0x181f   :  { %1741 = vst [vmem:[#allocation5] sm:$0x3] %v1738_v33 }
0x1820   :  { %2219 = shalt.err (!%p2216_p9)
}
0x1821   :  { %1751 = dma.vmem_to_hbm [thread:$0]  %s1749_s21, 32, %s2555_s2, [#allocation4]  }
0x1822   :  { %2230 = dma.done.wait [#allocation4], 32  }
0x1823   :  { %2231 = vsyncadd [#allocation4], 4294967264 }
0x1824   :  { %1755 = vsyncpa [#allocation3], 1 }
0x1825   :  { %1756 = vsyncpa [#allocation4], 1 }

</bundles_post_ra>
